<compile_context>
chip_gen: v5e
topology: v5e:2x2
jax: 0.10.0
libtpu: 0.0.40
codegen_flags: <defaults>
</compile_context>

<pallas_src>
import math

import jax
import jax.numpy as jnp
from jax.experimental import pallas as pl
from jax.experimental.pallas import tpu as pltpu


def _elu(v):
    # ELU(alpha=1).  exp(min(v, 0)) - 1 clamps the exp argument so the
    # discarded (v > 0) branch cannot overflow.  (True expm1 would be slightly
    # more accurate for tiny |v|, but the abs error here is ~f32 eps and is
    # dwarfed by the bf16 MXU inputs; exp is guaranteed to lower on Mosaic.)
    return jnp.where(v > 0.0, v, jnp.exp(jnp.minimum(v, 0.0)) - 1.0)


def _make_generator_kernel(nlayers):
    """Builds a fused kernel for `nlayers` hidden layers + output layer."""

    def kernel(x_ref, *refs):
        o_ref = refs[-1]
        wb = refs[:-1]                       # [w0, b0, w1, b1, ..., wo, bo]

        # Transposed layout: x tile is [n_in, TILE_B] (batch on the lane axis).
        h = x_ref[...]                       # bf16 [n_in, TILE_B]
        for n in range(nlayers):
            w = wb[2 * n][...]               # bf16 [n_hid, fan_in]
            b = wb[2 * n + 1][...]           # f32  [n_hid, 1]
            z = jnp.dot(w, h, preferred_element_type=jnp.float32) + b
            h = _elu(z).astype(w.dtype)      # back to bf16 for the next MXU op

        wo = wb[2 * nlayers][...]            # bf16 [n_out, n_hid]
        bo = wb[2 * nlayers + 1][...]        # f32  [n_out, 1]
        z = jnp.dot(wo, h, preferred_element_type=jnp.float32) + bo
        # Sigmoid: exp on the EUP, reciprocal on the EUP (approx), no VALU div.
        o_ref[...] = pl.reciprocal(1.0 + jnp.exp(-z), approx=True)

    return kernel


def generator_forward(x, params, *, tile_b=256):
    """Forward pass of the Generator MLP.

    x:      [B, n_in] float32 (batch-major, as in the PyTorch module).
    params: list of (W, b) with W in PyTorch layout [out_features, in_features]
            and b of shape [out_features].
    Returns [B, n_out] float32.
    """
    nlayers = len(params) - 1
    B, n_in = x.shape
    n_hid = params[0][0].shape[0]
    n_out = params[-1][0].shape[0]

    # Lane tile: multiple of 128, at most the (rounded-up) batch.
    tile_b = max(128, min(tile_b, pl.cdiv(B, 128) * 128))
    b_pad = pl.cdiv(B, tile_b) * tile_b
    grid = (b_pad // tile_b,)

    # Transpose so batch sits on the lane axis; pad batch; feed bf16 to the MXU.
    x_t = jnp.zeros((n_in, b_pad), jnp.bfloat16).at[:, :B].set(
        x.T.astype(jnp.bfloat16))

    # Weights as bf16 [out, in]; biases as f32 column vectors [out, 1].
    flat = []
    for w, b in params:
        flat.append(w.astype(jnp.bfloat16))
        flat.append(b.reshape(-1, 1).astype(jnp.float32))

    # Weights/biases: full-array blocks with a constant index_map -> DMA'd once,
    # resident in VMEM across all grid steps.
    def const_spec(a):
        return pl.BlockSpec(a.shape, lambda i: (0,) * a.ndim)

    in_specs = [pl.BlockSpec((n_in, tile_b), lambda i: (0, i))]
    in_specs += [const_spec(a) for a in flat]
    out_spec = pl.BlockSpec((n_out, tile_b), lambda i: (0, i))

    flops = 2 * b_pad * (n_in * n_hid + (nlayers - 1) * n_hid * n_hid
                         + n_hid * n_out)
    transcendentals = b_pad * (nlayers * n_hid + n_out)
    bytes_accessed = (b_pad * n_in * 2 + b_pad * n_out * 4
                      + sum(int(a.size) * a.dtype.itemsize for a in flat))

    out_t = pl.pallas_call(
        _make_generator_kernel(nlayers),
        out_shape=jax.ShapeDtypeStruct((n_out, b_pad), jnp.float32),
        grid=grid,
        in_specs=in_specs,
        out_specs=out_spec,
        compiler_params=pltpu.CompilerParams(
            dimension_semantics=("parallel",)),
        cost_estimate=pl.CostEstimate(
            flops=flops,
            transcendentals=transcendentals,
            bytes_accessed=bytes_accessed),
    )(x_t, *flat)

    # Back to [B, n_out] (layout plumbing only).
    return out_t[:, :B].T


# ----------------------------------------------------------------------------
# Parameter init (matches nn.Linear + xavier_uniform_(gain=1), bias zero-init).
# ----------------------------------------------------------------------------
def xavier_uniform(key, fan_out, fan_in, gain=1.0):
    # torch weight layout is [out_features, in_features]; the xavier bound is
    # symmetric in fan_in/fan_out.
    a = gain * math.sqrt(6.0 / (fan_in + fan_out))
    return jax.random.uniform(key, (fan_out, fan_in), jnp.float32, -a, a)


def init_generator_params(key, n_in, n_out, n_hid=10, nlayers=3):
    params = []
    keys = jax.random.split(key, nlayers + 1)
    for n in range(nlayers):
        fin = n_in if n == 0 else n_hid
        w = xavier_uniform(keys[n], n_hid, fin)
        b = jnp.zeros((n_hid,), jnp.float32)
        params.append((w, b))
    wo = xavier_uniform(keys[nlayers], n_out, n_hid)
    bo = jnp.zeros((n_out,), jnp.float32)
    params.append((wo, bo))
    return params


# ----------------------------------------------------------------------------
# Pure-JAX references.
# ----------------------------------------------------------------------------
def reference_forward_f32(x, params):
    """Full-f32 reference matching the PyTorch module semantics."""
    h = x
    for w, b in params[:-1]:
        h = jax.nn.elu(h @ w.T + b, alpha=1.0)
    wo, bo = params[-1]
    return jax.nn.sigmoid(h @ wo.T + bo)


def reference_forward_bf16(x, params):
    """Reference mimicking the kernel's numerics (bf16 MXU inputs, f32 math)."""
    h = x.astype(jnp.bfloat16)
    for w, b in params[:-1]:
        z = jnp.dot(h, w.T.astype(jnp.bfloat16),
                    preferred_element_type=jnp.float32) + b
        h = _elu(z).astype(jnp.bfloat16)
    wo, bo = params[-1]
    z = jnp.dot(h, wo.T.astype(jnp.bfloat16),
                preferred_element_type=jnp.float32) + bo
    return 1.0 / (1.0 + jnp.exp(-z))


if __name__ == "__main__":
    # Module defaults: nlayers=3; small but pipeline-exercising shapes
    # (B=1000 -> padded to 1024 -> 4 grid steps of 256 lanes).
    B, N_IN, N_HID, N_OUT, NLAYERS = 1000, 16, 32, 8, 3

    key = jax.random.PRNGKey(0)
    k_x, k_p = jax.random.split(key)

    x = jax.random.normal(k_x, (B, N_IN), jnp.float32)
    params = init_generator_params(k_p, N_IN, N_OUT, n_hid=N_HID, nlayers=NLAYERS)

    out = generator_forward(x, params, tile_b=256)
    out = jax.block_until_ready(out)
    assert out.shape == (B, N_OUT)

    ref_bf16 = reference_forward_bf16(x, params)   # same numerics as kernel
    ref_f32 = reference_forward_f32(x, params)     # module (f32) semantics
    assert jnp.allclose(out, ref_bf16, atol=5e-3, rtol=1e-2), \
        "mismatch vs bf16-numerics reference"
    assert jnp.allclose(out, ref_f32, atol=5e-2, rtol=5e-2), \
        "mismatch vs f32 reference"

    print("KERNEL_OK")
</pallas_src>

<mosaic_0001>
module attributes {stable_mosaic.version = 11 : i64} {
  func.func @kernel(%arg0: i32, %arg1: memref<16x256xbf16, #tpu.memory_space<vmem>>, %arg2: memref<32x16xbf16, #tpu.memory_space<vmem>>, %arg3: memref<32x1xf32, #tpu.memory_space<vmem>>, %arg4: memref<32x32xbf16, #tpu.memory_space<vmem>>, %arg5: memref<32x1xf32, #tpu.memory_space<vmem>>, %arg6: memref<32x32xbf16, #tpu.memory_space<vmem>>, %arg7: memref<32x1xf32, #tpu.memory_space<vmem>>, %arg8: memref<8x32xbf16, #tpu.memory_space<vmem>>, %arg9: memref<8x1xf32, #tpu.memory_space<vmem>>, %arg10: memref<8x256xf32, #tpu.memory_space<vmem>>) attributes {dimension_semantics = [#tpu.dimension_semantics<parallel>], iteration_bounds = array<i64: 4>, scalar_prefetch = 0 : i64, scratch_operands = 0 : i64, tpu.core_type = #tpu.core_type<tc>, window_params = [{transform_indices = @transform_0, window_bounds = array<i64: 16, 256>}, {pipeline_mode = #tpu.pipeline_mode<synchronous>, transform_indices = @transform_1, window_bounds = array<i64: 32, 16>}, {pipeline_mode = #tpu.pipeline_mode<synchronous>, transform_indices = @transform_2, window_bounds = array<i64: 32, 1>}, {pipeline_mode = #tpu.pipeline_mode<synchronous>, transform_indices = @transform_3, window_bounds = array<i64: 32, 32>}, {pipeline_mode = #tpu.pipeline_mode<synchronous>, transform_indices = @transform_4, window_bounds = array<i64: 32, 1>}, {pipeline_mode = #tpu.pipeline_mode<synchronous>, transform_indices = @transform_5, window_bounds = array<i64: 32, 32>}, {pipeline_mode = #tpu.pipeline_mode<synchronous>, transform_indices = @transform_6, window_bounds = array<i64: 32, 1>}, {pipeline_mode = #tpu.pipeline_mode<synchronous>, transform_indices = @transform_7, window_bounds = array<i64: 8, 32>}, {pipeline_mode = #tpu.pipeline_mode<synchronous>, transform_indices = @transform_8, window_bounds = array<i64: 8, 1>}, {transform_indices = @transform_9, window_bounds = array<i64: 8, 256>}]} {
    %c0 = arith.constant 0 : index
    %c0_0 = arith.constant 0 : index
    %0 = vector.load %arg1[%c0, %c0_0] : memref<16x256xbf16, #tpu.memory_space<vmem>>, vector<16x256xbf16>
    %c0_1 = arith.constant 0 : index
    %c0_2 = arith.constant 0 : index
    %1 = vector.load %arg2[%c0_1, %c0_2] : memref<32x16xbf16, #tpu.memory_space<vmem>>, vector<32x16xbf16>
    %c0_3 = arith.constant 0 : index
    %c0_4 = arith.constant 0 : index
    %2 = vector.load %arg3[%c0_3, %c0_4] : memref<32x1xf32, #tpu.memory_space<vmem>>, vector<32x1xf32>
    %cst = arith.constant dense<0.000000e+00> : vector<32x256xf32>
    %3 = tpu.matmul %1, %0, %cst {dimension_numbers = #tpu.dot_dimension_numbers<[1], [0], [0], [1], [0, 0, 1, 1], [], []>} : vector<32x16xbf16>, vector<16x256xbf16>, vector<32x256xf32> -> vector<32x256xf32>
    %4 = vector.broadcast %2 : vector<32x1xf32> to vector<32x256xf32>
    %5 = arith.addf %3, %4 : vector<32x256xf32>
    %cst_5 = arith.constant 0.000000e+00 : f32
    %6 = vector.broadcast %cst_5 : f32 to vector<32x256xf32>
    %7 = arith.cmpf ogt, %5, %6 : vector<32x256xf32>
    %cst_6 = arith.constant 0.000000e+00 : f32
    %8 = vector.broadcast %cst_6 : f32 to vector<32x256xf32>
    %9 = arith.minimumf %5, %8 : vector<32x256xf32>
    %10 = math.exp %9 : vector<32x256xf32>
    %cst_7 = arith.constant 1.000000e+00 : f32
    %11 = vector.broadcast %cst_7 : f32 to vector<32x256xf32>
    %12 = arith.subf %10, %11 : vector<32x256xf32>
    %13 = arith.select %7, %5, %12 : vector<32x256xi1>, vector<32x256xf32>
    %14 = arith.truncf %13 : vector<32x256xf32> to vector<32x256xbf16>
    %c0_8 = arith.constant 0 : index
    %c0_9 = arith.constant 0 : index
    %15 = vector.load %arg4[%c0_8, %c0_9] : memref<32x32xbf16, #tpu.memory_space<vmem>>, vector<32x32xbf16>
    %c0_10 = arith.constant 0 : index
    %c0_11 = arith.constant 0 : index
    %16 = vector.load %arg5[%c0_10, %c0_11] : memref<32x1xf32, #tpu.memory_space<vmem>>, vector<32x1xf32>
    %cst_12 = arith.constant dense<0.000000e+00> : vector<32x256xf32>
    %17 = tpu.matmul %15, %14, %cst_12 {dimension_numbers = #tpu.dot_dimension_numbers<[1], [0], [0], [1], [0, 0, 1, 1], [], []>} : vector<32x32xbf16>, vector<32x256xbf16>, vector<32x256xf32> -> vector<32x256xf32>
    %18 = vector.broadcast %16 : vector<32x1xf32> to vector<32x256xf32>
    %19 = arith.addf %17, %18 : vector<32x256xf32>
    %cst_13 = arith.constant 0.000000e+00 : f32
    %20 = vector.broadcast %cst_13 : f32 to vector<32x256xf32>
    %21 = arith.cmpf ogt, %19, %20 : vector<32x256xf32>
    %cst_14 = arith.constant 0.000000e+00 : f32
    %22 = vector.broadcast %cst_14 : f32 to vector<32x256xf32>
    %23 = arith.minimumf %19, %22 : vector<32x256xf32>
    %24 = math.exp %23 : vector<32x256xf32>
    %cst_15 = arith.constant 1.000000e+00 : f32
    %25 = vector.broadcast %cst_15 : f32 to vector<32x256xf32>
    %26 = arith.subf %24, %25 : vector<32x256xf32>
    %27 = arith.select %21, %19, %26 : vector<32x256xi1>, vector<32x256xf32>
    %28 = arith.truncf %27 : vector<32x256xf32> to vector<32x256xbf16>
    %c0_16 = arith.constant 0 : index
    %c0_17 = arith.constant 0 : index
    %29 = vector.load %arg6[%c0_16, %c0_17] : memref<32x32xbf16, #tpu.memory_space<vmem>>, vector<32x32xbf16>
    %c0_18 = arith.constant 0 : index
    %c0_19 = arith.constant 0 : index
    %30 = vector.load %arg7[%c0_18, %c0_19] : memref<32x1xf32, #tpu.memory_space<vmem>>, vector<32x1xf32>
    %cst_20 = arith.constant dense<0.000000e+00> : vector<32x256xf32>
    %31 = tpu.matmul %29, %28, %cst_20 {dimension_numbers = #tpu.dot_dimension_numbers<[1], [0], [0], [1], [0, 0, 1, 1], [], []>} : vector<32x32xbf16>, vector<32x256xbf16>, vector<32x256xf32> -> vector<32x256xf32>
    %32 = vector.broadcast %30 : vector<32x1xf32> to vector<32x256xf32>
    %33 = arith.addf %31, %32 : vector<32x256xf32>
    %cst_21 = arith.constant 0.000000e+00 : f32
    %34 = vector.broadcast %cst_21 : f32 to vector<32x256xf32>
    %35 = arith.cmpf ogt, %33, %34 : vector<32x256xf32>
    %cst_22 = arith.constant 0.000000e+00 : f32
    %36 = vector.broadcast %cst_22 : f32 to vector<32x256xf32>
    %37 = arith.minimumf %33, %36 : vector<32x256xf32>
    %38 = math.exp %37 : vector<32x256xf32>
    %cst_23 = arith.constant 1.000000e+00 : f32
    %39 = vector.broadcast %cst_23 : f32 to vector<32x256xf32>
    %40 = arith.subf %38, %39 : vector<32x256xf32>
    %41 = arith.select %35, %33, %40 : vector<32x256xi1>, vector<32x256xf32>
    %42 = arith.truncf %41 : vector<32x256xf32> to vector<32x256xbf16>
    %c0_24 = arith.constant 0 : index
    %c0_25 = arith.constant 0 : index
    %43 = vector.load %arg8[%c0_24, %c0_25] : memref<8x32xbf16, #tpu.memory_space<vmem>>, vector<8x32xbf16>
    %c0_26 = arith.constant 0 : index
    %c0_27 = arith.constant 0 : index
    %44 = vector.load %arg9[%c0_26, %c0_27] : memref<8x1xf32, #tpu.memory_space<vmem>>, vector<8x1xf32>
    %cst_28 = arith.constant dense<0.000000e+00> : vector<8x256xf32>
    %45 = tpu.matmul %43, %42, %cst_28 {dimension_numbers = #tpu.dot_dimension_numbers<[1], [0], [0], [1], [0, 0, 1, 1], [], []>} : vector<8x32xbf16>, vector<32x256xbf16>, vector<8x256xf32> -> vector<8x256xf32>
    %46 = vector.broadcast %44 : vector<8x1xf32> to vector<8x256xf32>
    %47 = arith.addf %45, %46 : vector<8x256xf32>
    %cst_29 = arith.constant 0.000000e+00 : f32
    %48 = vector.broadcast %cst_29 : f32 to vector<8x256xf32>
    %49 = arith.subf %48, %47 : vector<8x256xf32>
    %50 = math.exp %49 : vector<8x256xf32>
    %cst_30 = arith.constant 1.000000e+00 : f32
    %51 = vector.broadcast %cst_30 : f32 to vector<8x256xf32>
    %52 = arith.addf %51, %50 : vector<8x256xf32>
    %53 = tpu.reciprocal %52 {approx = true} : vector<8x256xf32> -> vector<8x256xf32>
    %c0_31 = arith.constant 0 : index
    %c0_32 = arith.constant 0 : index
    %54 = vector.load %arg10[%c0_31, %c0_32] : memref<8x256xf32, #tpu.memory_space<vmem>>, vector<8x256xf32>
    tpu.vector_store %arg10[%c0_31, %c0_32], %53 {strides = array<i32>} : memref<8x256xf32, #tpu.memory_space<vmem>>, vector<8x256xf32>,
    return
  }
  func.func @transform_0(%arg0: i32) -> (i32, i32) {
    %c0_i32 = arith.constant 0 : i32
    %c0_i32_0 = arith.constant 0 : i32
    return %c0_i32, %arg0 : i32, i32
  }
  func.func @transform_1(%arg0: i32) -> (i32, i32) {
    %c0_i32 = arith.constant 0 : i32
    %c0_i32_0 = arith.constant 0 : i32
    %c0_i32_1 = arith.constant 0 : i32
    return %c0_i32, %c0_i32_0 : i32, i32
  }
  func.func @transform_2(%arg0: i32) -> (i32, i32) {
    %c0_i32 = arith.constant 0 : i32
    %c0_i32_0 = arith.constant 0 : i32
    %c0_i32_1 = arith.constant 0 : i32
    return %c0_i32, %c0_i32_0 : i32, i32
  }
  func.func @transform_3(%arg0: i32) -> (i32, i32) {
    %c0_i32 = arith.constant 0 : i32
    %c0_i32_0 = arith.constant 0 : i32
    %c0_i32_1 = arith.constant 0 : i32
    return %c0_i32, %c0_i32_0 : i32, i32
  }
  func.func @transform_4(%arg0: i32) -> (i32, i32) {
    %c0_i32 = arith.constant 0 : i32
    %c0_i32_0 = arith.constant 0 : i32
    %c0_i32_1 = arith.constant 0 : i32
    return %c0_i32, %c0_i32_0 : i32, i32
  }
  func.func @transform_5(%arg0: i32) -> (i32, i32) {
    %c0_i32 = arith.constant 0 : i32
    %c0_i32_0 = arith.constant 0 : i32
    %c0_i32_1 = arith.constant 0 : i32
    return %c0_i32, %c0_i32_0 : i32, i32
  }
  func.func @transform_6(%arg0: i32) -> (i32, i32) {
    %c0_i32 = arith.constant 0 : i32
    %c0_i32_0 = arith.constant 0 : i32
    %c0_i32_1 = arith.constant 0 : i32
    return %c0_i32, %c0_i32_0 : i32, i32
  }
  func.func @transform_7(%arg0: i32) -> (i32, i32) {
    %c0_i32 = arith.constant 0 : i32
    %c0_i32_0 = arith.constant 0 : i32
    %c0_i32_1 = arith.constant 0 : i32
    return %c0_i32, %c0_i32_0 : i32, i32
  }
  func.func @transform_8(%arg0: i32) -> (i32, i32) {
    %c0_i32 = arith.constant 0 : i32
    %c0_i32_0 = arith.constant 0 : i32
    %c0_i32_1 = arith.constant 0 : i32
    return %c0_i32, %c0_i32_0 : i32, i32
  }
  func.func @transform_9(%arg0: i32) -> (i32, i32) {
    %c0_i32 = arith.constant 0 : i32
    %c0_i32_0 = arith.constant 0 : i32
    return %c0_i32, %arg0 : i32, i32
  }
}

</mosaic_0001>

<bundles_post_ra>
// kernel: tpu_custom_call.1
= control target key start
LH: loop header
LB: loop body
LE: loop exit
PB: predicated region body
PF: predicated region fallthrough
CT: control target
= control target key end

     0   :  { %14 = vsyncpa [#allocation4], 0  ;;  %s1441_s0 = inlined_call_operand.vmem [shape: bf16[16,1024], index: 0, kind: input, shape index: {}]   ;;  %s1442_s1 = inlined_call_operand.vmem [shape: bf16[32,16], index: 1, kind: input, shape index: {}]   ;;  %s1443_s2 = inlined_call_operand.vmem [shape: f32[32,1], index: 2, kind: input, shape index: {}]   ;;  %s1444_s3 = inlined_call_operand.vmem [shape: bf16[32,32], index: 3, kind: input, shape index: {}]   ;;  %s1445_s4 = inlined_call_operand.vmem [shape: f32[32,1], index: 4, kind: input, shape index: {}]   ;;  %s1446_s5 = inlined_call_operand.vmem [shape: bf16[32,32], index: 5, kind: input, shape index: {}]   ;;  %s1447_s6 = inlined_call_operand.vmem [shape: f32[32,1], index: 6, kind: input, shape index: {}]   ;;  %s1448_s7 = inlined_call_operand.vmem [shape: bf16[8,32], index: 7, kind: input, shape index: {}]   ;;  %s1449_s8 = inlined_call_operand.vmem [shape: f32[8,1], index: 8, kind: input, shape index: {}]   ;;  %s1450_s9 = inlined_call_operand.hbm [shape: f32[8,1024], index: 9, kind: output, shape index: {}]  }
   0x1   :  { %16 = vsyncpa [#allocation4 + $0x1], 0  ;;  %s1228_s30 = smov 0   ;;  %s1230_s10 = smov 0  }
   0x2   :  { %s1232_s11 = smov 0   ;;  %s1234_s12 = smov 0  }
   0x3 LB: > { %s919_s13 = sadd.s32 4294967295, %s1175_s12   ;;  %s920_s14 = sadd.s32 4294967294, %s1175_s12   ;;  %s1175_s12 = sphi %s1234_s12, %s1456_s12   ;;  %s1171_s11 = sphi %s1232_s11, %s1455_s11   ;;  %s1167_s10 = sphi %s1230_s10, %s1454_s10   ;;  %s1163_s30 = sphi %s1228_s30, %s1453_s30  }
   0x4   : > { %s1251_s15 = sadd.s32 1, %s1175_s12   ;;  %s29_s16 = sadd.s32 1, %s1171_s11 }
   0x5   : > { %s26_s17 = ssub.s32 %s1175_s12, %s1251_s15  ;;  %p36_p0 = scmp.ne.s32.totalorder %s1171_s11, %s1167_s10 }
   0x6   : > { %p27_p1 = scmp.eq.s32.totalorder %s26_s17, 0  ;;  %p37_p2 = scmp.eq.s32.totalorder %s1175_s12, 0 }
   0x7   : > { %p234_p3 = scmp.eq.s32.totalorder %s919_s13, 3  ;;  %p239_p4 = scmp.ne.s32.totalorder %s1167_s10, %s1163_s30 }
   0x8   : > { %s1264_s18 = scalar_select %p27_p1, %s1171_s11, %s29_s16  }
   0x9   : > { %p38_p5 = por %p37_p2, %p36_p0  ;;  %p1266_p6 = por %p234_p3, %p36_p0 }
   0xa   : > { %p240_p7 = scmp.eq.s32.totalorder %s920_s14, 3  ;;  %p922_p9 = scmp.ge.s32.totalorder %s1175_s12, 4 }
   0xc   : > { %p1270_p8 = por %p240_p7, %p239_p4  ;;  %280 = sbr.rel (%p922_p9) target bundleno = 23 (0x17), region = 48 }
  0x11   : > { %283 = sbr.rel (!%p38_p5) target bundleno = 23 (0x17), region = 52  ;;  %s285_s21 = sand.u32 (%p38_p5), 1, %s1171_s11  }
  0x12   : > { %s1004_s22 = sshll.u32 (%p38_p5), %s1175_s12, 3  ;;  %s923_s23 = sshll.u32 (%p38_p5), %s285_s21, 4 }
  0x13   : > { %s290_s26 = scalar_lea.vmem (%p38_p5), %s1441_s0, %s1004_s22  ;;  %s287_s27 = scalar_lea.vmem (%p38_p5), [#allocation2], %s923_s23 }
  0x14   : > { %v321_v0 = vld [vmem:[%s290_s26] sm:$0xff] (%p38_p5) }
  0x15   : > { %v323_v1 = vld [vmem:[%s290_s26 + $0x20] sm:$0xff] (%p38_p5)  ;;  %322 = vst [vmem:[%s287_s27] sm:$0xff] (%p38_p5), %v321_v0 }
  0x16   : > { %324 = vst [vmem:[%s287_s27 + $0x8] sm:$0xff] %v323_v1 }
  0x17 PF: > { %p926_p10 = scmp.ge.s32.totalorder %s1175_s12, 1  ;;  %p329_p11 = scmp.lt.s32.totalorder %s1175_s12, 5 }
  0x19   : > { %p330_p12 = pnand %p926_p10, %p329_p11 }
  0x1a   : > { %s336_s14 = sand.u32 (!%p330_p12), 1, %s1167_s10   ;;  %s1013_s29 = sshll.u32 (!%p330_p12), %s919_s13, 4 }
  0x1b   : > { %333 = sbr.rel (%p330_p12) target bundleno = 728 (0x2d8), region = 90  ;;  %s1288_s16 = sshll.u32 (!%p330_p12), %s336_s14, 4 }
  0x1c   : > { %s338_s22 = scalar_lea.vmem (!%p330_p12), [#allocation2], %s1288_s16  ;;  %s370_s23 = scalar_lea.vmem (!%p330_p12), [#allocation3], %s1288_s16 }
  0x1d   : > { %s852_s24 = sshll.u32 (!%p330_p12), %s370_s23, 4  ;;  %s839_s13 = scalar_lea.sflag (!%p330_p12), [#allocation4], %s336_s14  ;;  %s853_s24 = int_to_ptr.vmem [resolvable:$true] %s852_s24 }
  0x1e   : > { %s1133_s16 = scalar_lea.hbm (!%p330_p12), %s1450_s9, 64 }
  0x20   : > { %v382_v2 = vld [vmem:[%s1443_s2 + $0x10] sm:$0xff]  ;;  %v1177_v3 = vmov 0   ;;  %v380_v4 = vld [vmem:[%s1443_s2] sm:$0xff]  ;;  %v1006_v6 = vld [vmem:[%s338_s22 + $0x4] sm:$0xf0]  ;;  %vm424_vm0 = vcmask 130048  }
  0x21   : > { %1054 = vset.pattern.permute.xlu0 %v1177_v3  ;;  %1055 = vset.pattern.permute.xlu1 %v1177_v3  ;;  %v939_v5 = vld [vmem:[%s338_s22] sm:$0xf]  ;;  %v1005_v7 = vld [vmem:[%s338_s22 + $0x4] sm:$0xf]  ;;  %v941_v9 = vld [vmem:[%s338_s22 + $0x8] sm:$0xf0]  ;;  %s850_s22 = scalar_lea.hbm %s1450_s9, %s1013_s29 }
  0x22   : > { %396 = vperm.xlu0 %1054, %v382_v2   ;;  %386 = vperm.xlu1 %1055, %v380_v4   ;;  %v940_v8 = vor.u32 %v1006_v6, %v939_v5  ;;  %v944_v10 = vor.u32 %v1005_v7, %v941_v9  ;;  %v1007_v11 = vld [vmem:[%s1442_s1] sm:$0xff]  ;;  %v383_v12 = vld [vmem:[%s1443_s2 + $0x18] sm:$0xff]  ;;  %v381_v13 = vld [vmem:[%s1443_s2 + $0x8] sm:$0xff]  ;;  %vm559_vm9 = vcmask 261120   ;;  %s854_s25 = sshll.u32 %s850_s22, 4  ;;  %s855_s25 = int_to_ptr.hbm [resolvable:$true] %s854_s25 }
  0x23   : > { %1056 = vset.pattern.permute.xlu2 %v1177_v3  ;;  %v525_v14 = vld [vmem:[%s1445_s4] sm:$0xff]  ;;  %v526_v15 = vld [vmem:[%s1445_s4 + $0x8] sm:$0xff]  ;;  %v663_v17 = vld [vmem:[%s1447_s6 + $0x18] sm:$0xff]  ;;  %s1127_s26 = sshra.s32 %s855_s25, 4  ;;  %s1128_s26 = int_to_ptr.hbm [resolvable:$true] %s1127_s26 }
  0x24   : > { %438 = vmatpush.bf16.msra.mxu0 %v940_v8  ;;  %457 = vmatpush.bf16.msra.mxu1 %v944_v10  ;;  %v1008_v16 = vld [vmem:[%s1442_s1 + $0x8] sm:$0xff]  ;;  %v660_v18 = vld [vmem:[%s1447_s6] sm:$0xff]  ;;  %v527_v61 = vld [vmem:[%s1445_s4 + $0x10] sm:$0xff]  ;;  %s1129_s27 = scalar_lea.hbm %s1128_s26, 16  ;;  %p1134_p2 = scmp.lt.s32.totalorder %s1128_s26, %s1450_s9 }
  0x25   : > { %v791_v19 = vld [vmem:[%s1449_s8] sm:$0xff]  ;;  %541 = vperm.xlu2 %1056, %v527_v61   ;;  %p1130_p13 = scmp.ne.s32.totalorder %s1128_s26, %s1129_s27  ;;  %p1135_p3 = scmp.lt.s32.totalorder %s1133_s16, %s1129_s27 }
  0x27   : > { %945 = vmatmul.msk.bf16.vlgmr.msra.gmra.mxu0 %vm424_vm0, %v1007_v11  ;;  %947 = vmatmul.msk.bf16.vlgmr.msra.gmra.mxu1 %vm424_vm0, %v1007_v11  ;;  %p1131_p0 = pnand %p1130_p13, %p1266_p6  ;;  %p1136_p4 = por %p1135_p3, %p1134_p2 }
  0x29   : > { %p1132_p1 = pneg %p1131_p0 }
  0x2a   : > { %401 = vperm.xlu0 %1054, %v383_v12   ;;  %391 = vperm.xlu1 %1055, %v381_v13  }
  0x2b   : > { %p1137_p5 = pnand %p1136_p4, %p1132_p1 }
  0x32   : > { %531 = vperm.xlu0 %1054, %v525_v14   ;;  %536 = vperm.xlu1 %1055, %v526_v15   ;;  %v528_v14 = vld [vmem:[%s1445_s4 + $0x18] sm:$0xff] }
  0x33   : > { %546 = vperm.xlu2 %1056, %v528_v14  }
  0x37   : > { %946 = vmatmul.msk.bf16.gmra.mxu0 %vm424_vm0, %v1008_v16  ;;  %948 = vmatmul.msk.bf16.gmra.mxu1 %vm424_vm0, %v1008_v16 }
  0x3a   : > { %681 = vperm.xlu0 %1054, %v663_v17   ;;  %666 = vperm.xlu1 %1055, %v660_v18  }
  0x42   : > { %794 = vperm.xlu0 %1054, %v791_v19  }
  0x94   : > { %v387_v22 = vpop.permute.xlu1 %386  ;;  %v397_v26 = vpop.permute.xlu0 %396 }
  0x9c   : > { %v392_v28 = vpop.permute.xlu1 %391  ;;  %v402_v44 = vpop.permute.xlu0 %401 }
  0xa4   : > { %v440_v20 = vpop.f32.mrf.mxu0  ;;  %v459_v21 = vpop.f32.mrf.mxu1 }
  0xa5   : > { %v1325_v25 = vadd.f32 %v440_v20, %v387_v22  ;;  %v1327_v27 = vadd.f32 %v459_v21, %v387_v22  ;;  %v1009_v22 = vld [vmem:[%s1444_s3] sm:$0xff] }
  0xa7   : > { %v477_v30 = vmin.f32 %v1325_v25, 0.0  ;;  %v478_v34 = vmin.f32 %v1327_v27, 0.0  ;;  %vm469_vm7 = vcmp.gt.f32.partialorder %v1325_v25, 0.0  ;;  %vm470_vm8 = vcmp.gt.f32.partialorder %v1327_v27, 0.0 }
  0xa9   : > { %v485_v39 = vmul.f32 1.442695, %v477_v30  ;;  %v487_v41 = vmul.f32 1.442695, %v478_v34  ;;  %v532_v30 = vpop.permute.xlu0 %531  ;;  %v537_v34 = vpop.permute.xlu1 %536 }
  0xab   : > { %1057 = vpow2.f32 %v485_v39 }
  0xac   : > { %v442_v23 = vpop.f32.mrf.mxu0  ;;  %v461_v24 = vpop.f32.mrf.mxu1  ;;  %1059 = vpow2.f32 %v487_v41 }
  0xad   : > { %v1330_v31 = vadd.f32 %v442_v23, %v392_v28  ;;  %v1333_v35 = vadd.f32 %v461_v24, %v392_v28  ;;  %v662_v23 = vld [vmem:[%s1447_s6 + $0x10] sm:$0xff]  ;;  %v661_v24 = vld [vmem:[%s1447_s6 + $0x8] sm:$0xff] }
  0xae   : > { %676 = vperm.xlu2 %1056, %v662_v23  }
  0xaf   : > { %v479_v40 = vmin.f32 %v1330_v31, 0.0  ;;  %v480_v42 = vmin.f32 %v1333_v35, 0.0  ;;  %vm471_vm1 = vcmp.gt.f32.partialorder %v1330_v31, 0.0  ;;  %vm472_vm6 = vcmp.gt.f32.partialorder %v1333_v35, 0.0 }
  0xb1   : > { %v489_v47 = vmul.f32 1.442695, %v479_v40  ;;  %v491_v50 = vmul.f32 1.442695, %v480_v42  ;;  %v1058_v56 = vpop.eup %1057 }
  0xb2   : > { %v1060_v57 = vpop.eup %1059  ;;  %v949_v4 = vadd.f32 -1.0, %v1058_v56 }
  0xb3   : > { %v950_v13 = vadd.f32 -1.0, %v1060_v57 }
  0xb4   : > { %v445_v29 = vpop.f32.mrf.mxu0  ;;  %v464_v33 = vpop.f32.mrf.mxu1  ;;  %v509_v18 = vsel %vm469_vm7, %v1325_v25, %v949_v4  ;;  %v1010_v25 = vld [vmem:[%s1444_s3 + $0x8] sm:$0xff] }
  0xb5   : > { %v446_v32 = vadd.f32 %v445_v29, %v397_v26  ;;  %v465_v36 = vadd.f32 %v464_v33, %v397_v26  ;;  %v510_v20 = vsel %vm470_vm8, %v1327_v27, %v950_v13 }
  0xb6   : > { %671 = vperm.xlu2 %1056, %v661_v24  }
  0xb7   : > { %v481_v37 = vmin.f32 %v446_v32, 0.0  ;;  %v482_v38 = vmin.f32 %v465_v36, 0.0  ;;  %vm473_vm2 = vcmp.gt.f32.partialorder %v446_v32, 0.0  ;;  %vm474_vm4 = vcmp.gt.f32.partialorder %v465_v36, 0.0 }
  0xb9   : > { %v493_v43 = vmul.f32 1.442695, %v481_v37  ;;  %v495_v45 = vmul.f32 1.442695, %v482_v38 }
  0xbb   : > { %1061 = vpow2.f32 %v493_v43 }
  0xbc   : > { %v447_v46 = vpop.f32.mrf.mxu0  ;;  %v466_v49 = vpop.f32.mrf.mxu1  ;;  %1063 = vpow2.f32 %v495_v45 }
  0xbd   : > { %v448_v48 = vadd.f32 %v447_v46, %v402_v44  ;;  %v467_v51 = vadd.f32 %v466_v49, %v402_v44  ;;  %1065 = vpow2.f32 %v489_v47 }
  0xbe   : > { %1067 = vpow2.f32 %v491_v50 }
  0xbf   : > { %v483_v52 = vmin.f32 %v448_v48, 0.0  ;;  %v484_v53 = vmin.f32 %v467_v51, 0.0  ;;  %vm475_vm3 = vcmp.gt.f32.partialorder %v448_v48, 0.0  ;;  %vm476_vm5 = vcmp.gt.f32.partialorder %v467_v51, 0.0 }
  0xc1   : > { %v497_v54 = vmul.f32 1.442695, %v483_v52  ;;  %v499_v55 = vmul.f32 1.442695, %v484_v53  ;;  %v1062_v58 = vpop.eup %1061 }
  0xc2   : > { %v1064_v59 = vpop.eup %1063  ;;  %v953_v63 = vadd.f32 -1.0, %v1062_v58 }
  0xc3   : > { %1069 = vpow2.f32 %v497_v54  ;;  %v1066_v60 = vpop.eup %1065  ;;  %v954_v1 = vadd.f32 -1.0, %v1064_v59 }
  0xc4   : > { %1071 = vpow2.f32 %v499_v55  ;;  %v1068_v62 = vpop.eup %1067  ;;  %v951_v5 = vadd.f32 -1.0, %v1066_v60  ;;  %v513_v8 = vsel %vm473_vm2, %v446_v32, %v953_v63  ;;  %v542_v32 = vpop.permute.xlu2 %541 }
  0xc5   : > { %v952_v7 = vadd.f32 -1.0, %v1068_v62  ;;  %v514_v11 = vsel %vm474_vm4, %v465_v36, %v954_v1 }
  0xc6   : > { %v511_v16 = vsel %vm471_vm1, %v1330_v31, %v951_v5 }
  0xc7   : > { %v512_v17 = vsel %vm472_vm6, %v1333_v35, %v952_v7  ;;  %v517_v19 = vpack.c.bf16 %v511_v16, %v509_v18 }
  0xc8   : > { %v518_v21 = vpack.c.bf16 %v512_v17, %v510_v20 }
  0xc9   : > { %v1070_v0 = vpop.eup %1069 }
  0xca   : > { %v1072_v2 = vpop.eup %1071  ;;  %v955_v3 = vadd.f32 -1.0, %v1070_v0 }
  0xcb   : > { %v956_v6 = vadd.f32 -1.0, %v1072_v2 }
  0xcc   : > { %v515_v9 = vsel %vm475_vm3, %v448_v48, %v955_v3  ;;  %v547_v50 = vpop.permute.xlu2 %546 }
  0xcd   : > { %v519_v10 = vpack.c.bf16 %v515_v9, %v513_v8  ;;  %v516_v12 = vsel %vm476_vm5, %v467_v51, %v956_v6 }
  0xce   : > { %v520_v15 = vpack.c.bf16 %v516_v12, %v514_v11 }
  0xcf   : > { %572 = vmatpush.bf16.msra.mxu2 %v519_v10 }
  0xd0   : > { %591 = vmatpush.bf16.msra.mxu3 %v520_v15 }
  0xd3   : > { %573 = vmatpush.bf16.msra.mxu2 %v517_v19 }
  0xd4   : > { %592 = vmatpush.bf16.msra.mxu3 %v518_v21 }
  0xd6   : > { %965 = vmatmul.msk.bf16.vlgmr.msra.gmra.mxu2 %vm559_vm9, %v1009_v22 }
  0xd7   : > { %967 = vmatmul.msk.bf16.vlgmr.msra.gmra.mxu3 %vm559_vm9, %v1009_v22 }
  0xe6   : > { %966 = vmatmul.msk.bf16.gmra.mxu2 %vm559_vm9, %v1010_v25 }
  0xe7   : > { %968 = vmatmul.msk.bf16.gmra.mxu3 %vm559_vm9, %v1010_v25 }
 0x159   : > { %v575_v26 = vpop.f32.mrf.mxu2 }
 0x15a   : > { %v594_v27 = vpop.f32.mrf.mxu3  ;;  %v1369_v31 = vadd.f32 %v575_v26, %v532_v30  ;;  %v1011_v26 = vld [vmem:[%s1446_s5] sm:$0xff] }
 0x15b   : > { %v1371_v33 = vadd.f32 %v594_v27, %v532_v30  ;;  %v1012_v27 = vld [vmem:[%s1446_s5 + $0x8] sm:$0xff]  ;;  %v677_v30 = vpop.permute.xlu2 %676 }
 0x15c   : > { %v612_v36 = vmin.f32 %v1369_v31, 0.0  ;;  %vm604_vm0 = vcmp.gt.f32.partialorder %v1369_v31, 0.0 }
 0x15d   : > { %v613_v40 = vmin.f32 %v1371_v33, 0.0  ;;  %vm605_vm1 = vcmp.gt.f32.partialorder %v1371_v33, 0.0 }
 0x15e   : > { %v620_v45 = vmul.f32 1.442695, %v612_v36 }
 0x15f   : > { %v622_v47 = vmul.f32 1.442695, %v613_v40 }
 0x160   : > { %1073 = vpow2.f32 %v620_v45 }
 0x161   : > { %v577_v28 = vpop.f32.mrf.mxu2  ;;  %1075 = vpow2.f32 %v622_v47 }
 0x162   : > { %v596_v29 = vpop.f32.mrf.mxu3  ;;  %v578_v37 = vadd.f32 %v577_v28, %v537_v34 }
 0x163   : > { %v597_v41 = vadd.f32 %v596_v29, %v537_v34  ;;  %v672_v36 = vpop.permute.xlu2 %671 }
 0x164   : > { %v614_v46 = vmin.f32 %v578_v37, 0.0  ;;  %vm606_vm10 = vcmp.gt.f32.partialorder %v578_v37, 0.0 }
 0x165   : > { %v615_v48 = vmin.f32 %v597_v41, 0.0  ;;  %vm607_vm15 = vcmp.gt.f32.partialorder %v597_v41, 0.0 }
 0x166   : > { %v624_v53 = vmul.f32 1.442695, %v614_v46  ;;  %v1074_v62 = vpop.eup %1073 }
 0x167   : > { %v626_v56 = vmul.f32 1.442695, %v615_v48  ;;  %v1076_v63 = vpop.eup %1075  ;;  %v969_v9 = vadd.f32 -1.0, %v1074_v62 }
 0x168   : > { %v970_v18 = vadd.f32 -1.0, %v1076_v63 }
 0x169   : > { %v580_v35 = vpop.f32.mrf.mxu2  ;;  %v644_v22 = vsel %vm604_vm0, %v1369_v31, %v969_v9 }
 0x16a   : > { %v581_v38 = vadd.f32 %v580_v35, %v542_v32  ;;  %v599_v39 = vpop.f32.mrf.mxu3  ;;  %v645_v24 = vsel %vm605_vm1, %v1371_v33, %v970_v18  ;;  %v667_v33 = vpop.permute.xlu1 %666 }
 0x16b   : > { %v600_v42 = vadd.f32 %v599_v39, %v542_v32 }
 0x16c   : > { %v616_v43 = vmin.f32 %v581_v38, 0.0  ;;  %vm608_vm11 = vcmp.gt.f32.partialorder %v581_v38, 0.0 }
 0x16d   : > { %v617_v44 = vmin.f32 %v600_v42, 0.0  ;;  %vm609_vm13 = vcmp.gt.f32.partialorder %v600_v42, 0.0 }
 0x16e   : > { %v628_v49 = vmul.f32 1.442695, %v616_v43 }
 0x16f   : > { %v630_v51 = vmul.f32 1.442695, %v617_v44 }
 0x170   : > { %1077 = vpow2.f32 %v628_v49 }
 0x171   : > { %v582_v52 = vpop.f32.mrf.mxu2  ;;  %1079 = vpow2.f32 %v630_v51 }
 0x172   : > { %v583_v54 = vadd.f32 %v582_v52, %v547_v50  ;;  %v601_v55 = vpop.f32.mrf.mxu3  ;;  %1081 = vpow2.f32 %v624_v53  ;;  %v682_v52 = vpop.permute.xlu0 %681 }
 0x173   : > { %v602_v57 = vadd.f32 %v601_v55, %v547_v50  ;;  %1083 = vpow2.f32 %v626_v56 }
 0x174   : > { %v618_v58 = vmin.f32 %v583_v54, 0.0  ;;  %vm610_vm12 = vcmp.gt.f32.partialorder %v583_v54, 0.0 }
 0x175   : > { %v619_v59 = vmin.f32 %v602_v57, 0.0  ;;  %vm611_vm14 = vcmp.gt.f32.partialorder %v602_v57, 0.0 }
 0x176   : > { %v632_v60 = vmul.f32 1.442695, %v618_v58  ;;  %v1078_v0 = vpop.eup %1077 }
 0x177   : > { %v634_v61 = vmul.f32 1.442695, %v619_v59  ;;  %v1080_v1 = vpop.eup %1079  ;;  %v973_v4 = vadd.f32 -1.0, %v1078_v0 }
 0x178   : > { %1085 = vpow2.f32 %v632_v60  ;;  %v1082_v2 = vpop.eup %1081  ;;  %v974_v6 = vadd.f32 -1.0, %v1080_v1 }
 0x179   : > { %1087 = vpow2.f32 %v634_v61  ;;  %v1084_v3 = vpop.eup %1083  ;;  %v971_v10 = vadd.f32 -1.0, %v1082_v2  ;;  %v648_v13 = vsel %vm608_vm11, %v581_v38, %v973_v4 }
 0x17a   : > { %v972_v12 = vadd.f32 -1.0, %v1084_v3  ;;  %v649_v16 = vsel %vm609_vm13, %v600_v42, %v974_v6 }
 0x17b   : > { %v646_v20 = vsel %vm606_vm10, %v578_v37, %v971_v10 }
 0x17c   : > { %v647_v21 = vsel %vm607_vm15, %v597_v41, %v972_v12  ;;  %v652_v23 = vpack.c.bf16 %v646_v20, %v644_v22 }
 0x17d   : > { %v653_v25 = vpack.c.bf16 %v647_v21, %v645_v24 }
 0x17e   : > { %v1086_v5 = vpop.eup %1085 }
 0x17f   : > { %v1088_v7 = vpop.eup %1087  ;;  %v975_v8 = vadd.f32 -1.0, %v1086_v5 }
 0x180   : > { %v976_v11 = vadd.f32 -1.0, %v1088_v7 }
 0x181   : > { %v650_v14 = vsel %vm610_vm12, %v583_v54, %v975_v8 }
 0x182   : > { %v654_v15 = vpack.c.bf16 %v650_v14, %v648_v13  ;;  %v651_v17 = vsel %vm611_vm14, %v602_v57, %v976_v11 }
 0x183   : > { %v655_v19 = vpack.c.bf16 %v651_v17, %v649_v16 }
 0x184   : > { %706 = vmatpush.bf16.msrb.mxu0 %v654_v15 }
 0x185   : > { %725 = vmatpush.bf16.msrb.mxu1 %v655_v19 }
 0x188   : > { %707 = vmatpush.bf16.msrb.mxu0 %v652_v23 }
 0x189   : > { %726 = vmatpush.bf16.msrb.mxu1 %v653_v25 }
 0x18b   : > { %985 = vmatmul.msk.bf16.vlgmr.msrb.gmra.mxu0 %vm559_vm9, %v1011_v26 }
 0x18c   : > { %987 = vmatmul.msk.bf16.vlgmr.msrb.gmra.mxu1 %vm559_vm9, %v1011_v26 }
 0x19b   : > { %986 = vmatmul.msk.bf16.gmra.mxu0 %vm559_vm9, %v1012_v27 }
 0x19c   : > { %988 = vmatmul.msk.bf16.gmra.mxu1 %vm559_vm9, %v1012_v27 }
 0x208   : > { %v709_v28 = vpop.f32.mrf.mxu0 }
 0x209   : > { %v728_v29 = vpop.f32.mrf.mxu1  ;;  %v1390_v34 = vadd.f32 %v709_v28, %v667_v33  ;;  %v790_v28 = vld [vmem:[%s1448_s7] sm:$0xf] }
 0x20a   : > { %v1392_v35 = vadd.f32 %v728_v29, %v667_v33  ;;  %v795_v29 = vpop.permute.xlu0 %794 }
 0x20b   : > { %v746_v38 = vmin.f32 %v1390_v34, 0.0  ;;  %vm738_vm8 = vcmp.gt.f32.partialorder %v1390_v34, 0.0 }
 0x20c   : > { %v747_v42 = vmin.f32 %v1392_v35, 0.0  ;;  %vm739_vm10 = vcmp.gt.f32.partialorder %v1392_v35, 0.0 }
 0x20d   : > { %v754_v47 = vmul.f32 1.442695, %v746_v38 }
 0x20e   : > { %v756_v49 = vmul.f32 1.442695, %v747_v42 }
 0x20f   : > { %1089 = vpow2.f32 %v754_v47 }
 0x210   : > { %v711_v31 = vpop.f32.mrf.mxu0  ;;  %1091 = vpow2.f32 %v756_v49 }
 0x211   : > { %v730_v32 = vpop.f32.mrf.mxu1  ;;  %v712_v39 = vadd.f32 %v711_v31, %v672_v36 }
 0x212   : > { %v731_v43 = vadd.f32 %v730_v32, %v672_v36 }
 0x213   : > { %v748_v48 = vmin.f32 %v712_v39, 0.0  ;;  %vm740_vm2 = vcmp.gt.f32.partialorder %v712_v39, 0.0 }
 0x214   : > { %v749_v50 = vmin.f32 %v731_v43, 0.0  ;;  %vm741_vm7 = vcmp.gt.f32.partialorder %v731_v43, 0.0 }
 0x215   : > { %v758_v55 = vmul.f32 1.442695, %v748_v48  ;;  %v1090_v0 = vpop.eup %1089 }
 0x216   : > { %v760_v58 = vmul.f32 1.442695, %v749_v50  ;;  %v1092_v1 = vpop.eup %1091  ;;  %v989_v11 = vadd.f32 -1.0, %v1090_v0 }
 0x217   : > { %v990_v20 = vadd.f32 -1.0, %v1092_v1 }
 0x218   : > { %v714_v37 = vpop.f32.mrf.mxu0  ;;  %v778_v24 = vsel %vm738_vm8, %v1390_v34, %v989_v11 }
 0x219   : > { %v715_v40 = vadd.f32 %v714_v37, %v677_v30  ;;  %v733_v41 = vpop.f32.mrf.mxu1  ;;  %v779_v26 = vsel %vm739_vm10, %v1392_v35, %v990_v20 }
 0x21a   : > { %v734_v44 = vadd.f32 %v733_v41, %v677_v30 }
 0x21b   : > { %v750_v45 = vmin.f32 %v715_v40, 0.0  ;;  %vm742_vm3 = vcmp.gt.f32.partialorder %v715_v40, 0.0 }
 0x21c   : > { %v751_v46 = vmin.f32 %v734_v44, 0.0  ;;  %vm743_vm5 = vcmp.gt.f32.partialorder %v734_v44, 0.0 }
 0x21d   : > { %v762_v51 = vmul.f32 1.442695, %v750_v45 }
 0x21e   : > { %v764_v53 = vmul.f32 1.442695, %v751_v46 }
 0x21f   : > { %1093 = vpow2.f32 %v762_v51 }
 0x220   : > { %v716_v54 = vpop.f32.mrf.mxu0  ;;  %1095 = vpow2.f32 %v764_v53 }
 0x221   : > { %v717_v56 = vadd.f32 %v716_v54, %v682_v52  ;;  %v735_v57 = vpop.f32.mrf.mxu1  ;;  %1097 = vpow2.f32 %v758_v55 }
 0x222   : > { %v736_v59 = vadd.f32 %v735_v57, %v682_v52  ;;  %1099 = vpow2.f32 %v760_v58 }
 0x223   : > { %v752_v60 = vmin.f32 %v717_v56, 0.0  ;;  %vm744_vm4 = vcmp.gt.f32.partialorder %v717_v56, 0.0 }
 0x224   : > { %v753_v61 = vmin.f32 %v736_v59, 0.0  ;;  %vm745_vm6 = vcmp.gt.f32.partialorder %v736_v59, 0.0 }
 0x225   : > { %v766_v62 = vmul.f32 1.442695, %v752_v60  ;;  %v1094_v2 = vpop.eup %1093 }
 0x226   : > { %v768_v63 = vmul.f32 1.442695, %v753_v61  ;;  %v1096_v3 = vpop.eup %1095  ;;  %v993_v6 = vadd.f32 -1.0, %v1094_v2 }
 0x227   : > { %1101 = vpow2.f32 %v766_v62  ;;  %v1098_v4 = vpop.eup %1097  ;;  %v994_v8 = vadd.f32 -1.0, %v1096_v3 }
 0x228   : > { %1103 = vpow2.f32 %v768_v63  ;;  %v1100_v5 = vpop.eup %1099  ;;  %v991_v12 = vadd.f32 -1.0, %v1098_v4  ;;  %v782_v15 = vsel %vm742_vm3, %v715_v40, %v993_v6 }
 0x229   : > { %v992_v14 = vadd.f32 -1.0, %v1100_v5  ;;  %v783_v18 = vsel %vm743_vm5, %v734_v44, %v994_v8 }
 0x22a   : > { %v780_v22 = vsel %vm740_vm2, %v712_v39, %v991_v12 }
 0x22b   : > { %v781_v23 = vsel %vm741_vm7, %v731_v43, %v992_v14  ;;  %v786_v25 = vpack.c.bf16 %v780_v22, %v778_v24 }
 0x22c   : > { %v787_v27 = vpack.c.bf16 %v781_v23, %v779_v26 }
 0x22d   : > { %v1102_v7 = vpop.eup %1101 }
 0x22e   : > { %v1104_v9 = vpop.eup %1103  ;;  %v995_v10 = vadd.f32 -1.0, %v1102_v7 }
 0x22f   : > { %v996_v13 = vadd.f32 -1.0, %v1104_v9 }
 0x230   : > { %v784_v16 = vsel %vm744_vm4, %v717_v56, %v995_v10 }
 0x231   : > { %v788_v17 = vpack.c.bf16 %v784_v16, %v782_v15  ;;  %v785_v19 = vsel %vm745_vm6, %v736_v59, %v996_v13 }
 0x232   : > { %v789_v21 = vpack.c.bf16 %v785_v19, %v783_v18 }
 0x233   : > { %806 = vmatpush.bf16.msrb.mxu2 %v788_v17 }
 0x234   : > { %819 = vmatpush.bf16.msrb.mxu3 %v789_v21 }
 0x237   : > { %807 = vmatpush.bf16.msrb.mxu2 %v786_v25 }
 0x238   : > { %820 = vmatpush.bf16.msrb.mxu3 %v787_v27 }
 0x23a   : > { %997 = vmatmul.msk.bf16.vlgmr.msrb.gmra.mxu2 %vm559_vm9, %v790_v28 }
 0x23b   : > { %998 = vmatmul.msk.bf16.vlgmr.msrb.gmra.mxu3 %vm559_vm9, %v790_v28 }
 0x2bd   : > { %v809_v30 = vpop.f32.mrf.mxu2 }
 0x2be   : > { %v810_v31 = vadd.f32 %v809_v30, %v795_v29  ;;  %v822_v32 = vpop.f32.mrf.mxu3 }
 0x2bf   : > { %v823_v33 = vadd.f32 %v822_v32, %v795_v29 }
 0x2c0   : > { %v826_v34 = vsub.f32 0.0, %v810_v31 }
 0x2c1   : > { %v827_v35 = vsub.f32 0.0, %v823_v33 }
 0x2c2   : > { %v828_v36 = vmul.f32 1.442695, %v826_v34 }
 0x2c3   : > { %v830_v37 = vmul.f32 1.442695, %v827_v35 }
 0x2c4   : > { %1105 = vpow2.f32 %v828_v36 }
 0x2c5   : > { %1107 = vpow2.f32 %v830_v37  ;;  %v811_v38 = vpop.f32.mrf.mxu2 }
 0x2c6   : > { %v824_v39 = vpop.f32.mrf.mxu3 }
 0x2ca   : > { %v1106_v40 = vpop.eup %1105 }
 0x2cb   : > { %v1108_v41 = vpop.eup %1107  ;;  %v832_v42 = vadd.f32 1.0, %v1106_v40 }
 0x2cc   : > { %v833_v43 = vadd.f32 1.0, %v1108_v41 }
 0x2cd   : > { %1109 = vrcp.f32 %v832_v42 }
 0x2ce   : > { %1111 = vrcp.f32 %v833_v43 }
 0x2d3   : > { %v1110_v44 = vpop.eup %1109 }
 0x2d4   : > { %v1112_v45 = vpop.eup %1111  ;;  %836 = vst [vmem:[%s370_s23] sm:$0xff] %v1110_v44 }
 0x2d5   : > { %837 = vst [vmem:[%s370_s23 + $0x8] sm:$0xff] %v1112_v45 }
 0x2d6   : > { %1140 = shalt.err (!%p1137_p5)
}
 0x2d7   : > { %1014 = dma.vmem_to_hbm [thread:$0]  (%p1266_p6), %s853_s24, 256, %s855_s25, %s839_s13  }
 0x2d8 PF: > { %p1020_p7 = scmp.ge.s32.totalorder %s1175_s12, 2  ;;  %s866_s14 = sand.u32 1, %s1163_s30  }
 0x2d9   : > { %s867_s22 = scalar_lea.sflag [#allocation4], %s866_s14 }
 0x2da   : > { %p1017_p9 = pnand %p1020_p7, %p1270_p8 }
 0x2dc   : > { %p1018_p10 = pneg %p1017_p9 }
 0x2de   : > { %1158 = dma.done.wait (%p1018_p10), %s867_s22, 256  }
 0x2df   : > { %1160 = vsyncadd (%p1018_p10), %s867_s22, 4294967040  ;;  %p19_p11 = scmp.ge.s32.totalorder %s1251_s15, 6   ;;  %s1453_s30 = smov %s1167_s10 }
 0x2e0   : > { %s1454_s10 = smov %s1171_s11  ;;  %s1455_s11 = smov %s1264_s18 }
 0x2e1   : > { %s1456_s12 = smov %s1251_s15  ;;  %21 = sbr.rel (!%p19_p11) target bundleno = 3 (0x3), region = 134 }
 0x2e6   :  { %873 = vsyncpa [#allocation4], 1 }
 0x2e7   :  { %875 = vsyncpa [#allocation4 + $0x1], 1 }

</bundles_post_ra>
